<compile_context>
chip_gen: v5e
topology: v5e:2x2
jax: 0.10.0
libtpu: 0.0.40
codegen_flags: <defaults>
</compile_context>

<pallas_src>
import functools

import jax
import jax.numpy as jnp
from jax.experimental import pallas as pl
from jax.experimental.pallas import tpu as pltpu

LANE = 128


def _cnn_maxpool_kernel(x_ref, w_ref, b_ref, o_ref, *, window_size, n_valid):
    # x_ref: (Bt, S, D) mxu-dtype   w_ref: (Kp, Cp) mxu-dtype
    # b_ref: (1, Cp) f32            o_ref: (Bt, Cp)
    Bt, S, D = x_ref.shape
    Kp, Cp = w_ref.shape
    M = Bt * S

    # Up-cast before reshape/roll/concatenate so all layout ops run on 32-bit
    # vregs; values round-trip exactly, so the bf16 dot below is unchanged.
    x32 = x_ref[...].astype(jnp.float32)
    x_flat = x32.reshape(M, D)  # free relayout: wrapper guarantees S % 8 == 0

    # im2col along lanes: LHS row t = [x[t], x[t+1], ..., x[t+ws-1], 0...].
    # Wrap-around rows (t >= S - w >= n_valid) are masked before the max.
    cols = [x_flat]
    for w in range(1, window_size):
        cols.append(pltpu.roll(x_flat, shift=M - w, axis=0))  # roll by -w rows
    k_pad = Kp - window_size * D
    if k_pad:
        cols.append(jnp.zeros((M, k_pad), dtype=jnp.float32))
    lhs = jnp.concatenate(cols, axis=1)  # (M, Kp), lane-dense

    # Single K=Kp matmul on the MXU, f32 accumulation.
    conv = jnp.dot(lhs.astype(w_ref.dtype), w_ref[...],
                   preferred_element_type=jnp.float32)  # (M, Cp)
    conv = conv.reshape(Bt, S, Cp)

    # Mask conv tail / roll wrap-around / padded-S rows, then max over time.
    t_idx = jax.lax.broadcasted_iota(jnp.int32, (S, 1), 0)
    conv = jnp.where((t_idx < n_valid)[None], conv, -jnp.inf)
    res = jnp.max(conv, axis=1) + b_ref[...]  # (Bt, Cp) f32, bias after max
    o_ref[...] = res.astype(o_ref.dtype)


def cnn_maxpool(x, weight, bias, *, batch_tile=None, mxu_dtype=jnp.bfloat16):
    """x: (B, S, D) f32; weight: (ws, D, C); bias: (C,) -> (B, C)."""
    B, S, D = x.shape
    ws, Dw, C = weight.shape
    if Dw != D:
        raise ValueError("weight word_dim mismatch")
    T = S - ws + 1
    if T < 1:
        raise ValueError("seq_len must be >= window_size")

    Cp = -(-C // LANE) * LANE                  # lane-dense output channels
    Kp = -(-(ws * D) // LANE) * LANE           # fused im2col K, padded to 128
    S_pad = -(-S // 8) * 8                     # sublane-aligned time axis
    assert T <= S_pad - (ws - 1)               # roll wrap-around stays masked

    in_bytes = jnp.dtype(mxu_dtype).itemsize
    # Rough per-row (row = one time position) VMEM bytes for tile sizing.
    per_row = (2 * D * in_bytes                # double-buffered x tile
               + (ws + 1) * D * 4              # f32 up-cast + rolled copies
               + Kp * (4 + in_bytes)           # f32 + mxu-dtype im2col LHS
               + Cp * 4)                       # f32 conv accumulator

    if batch_tile is None:
        bt = max(8, ((4096 // S_pad) // 8) * 8) if S_pad <= 4096 else 8
        bt = min(bt, -(-B // 8) * 8)           # don't over-pad tiny batches
        if bt >= B and B > 16:                 # keep >=2 steps for v7x megacore
            bt = max(8, ((-(-B // 2) + 7) // 8) * 8)
        while bt > 8 and bt * S_pad * per_row > (12 << 20):
            bt -= 8                            # v7x-safe per-step VMEM cap
        batch_tile = bt
    Bt = max(8, -(-batch_tile // 8) * 8)       # multiple of 8: unmasked stores
    n_tiles = -(-B // Bt)
    B_pad = n_tiles * Bt

    x_p = x
    if (B_pad, S_pad) != (B, S):
        x_p = jnp.pad(x, ((0, B_pad - B), (0, S_pad - S), (0, 0)))
    x_p = x_p.astype(mxu_dtype)                # halve x HBM/DMA bytes (bf16)

    # Weight (ws, D, C) -> (ws*D, C): row w*D+d = weight[w, d, :], matching the
    # im2col lane layout; pad K to Kp and C to Cp, cast for the MXU.
    w_p = jnp.pad(weight.reshape(ws * D, C),
                  ((0, Kp - ws * D), (0, Cp - C))).astype(mxu_dtype)
    b_p = jnp.pad(bias.astype(jnp.float32), (0, Cp - C)).reshape(1, Cp)

    out = pl.pallas_call(
        functools.partial(_cnn_maxpool_kernel, window_size=ws, n_valid=T),
        out_shape=jax.ShapeDtypeStruct((B_pad, Cp), jnp.float32),
        grid=(n_tiles,),
        in_specs=[
            pl.BlockSpec((Bt, S_pad, D), lambda b: (b, 0, 0)),  # batch tile of x
            pl.BlockSpec((Kp, Cp), lambda b: (0, 0)),           # fused weights
            pl.BlockSpec((1, Cp), lambda b: (0, 0)),            # bias
        ],
        out_specs=pl.BlockSpec((Bt, Cp), lambda b: (b, 0)),
        compiler_params=pltpu.CompilerParams(
            dimension_semantics=("parallel",),       # split tiles across TCs
            vmem_limit_bytes=32 * 1024 * 1024,       # explicit (v5e default is 16 MiB)
        ),
    )(x_p, w_p, b_p)
    return out[:B, :C].astype(x.dtype)


def cnn_maxpool_ref(x, weight, bias):
    # Pure-JAX reference mirroring the PyTorch module (f32 math).
    B, S, D = x.shape
    ws, _, C = weight.shape
    T = S - ws + 1
    windows = jnp.stack([x[:, w:w + T, :] for w in range(ws)], axis=2)  # (B,T,ws,D)
    conv = jnp.einsum("btwd,wdc->btc", windows, weight) + bias[None, None, :]
    return jnp.max(conv, axis=1)


if __name__ == "__main__":
    # Small shapes consistent with the module's forward: x (batch, seq_len, word_dim).
    batch, seq_len, word_dim = 2, 16, 32
    window_size, out_channels = 3, 8

    key = jax.random.PRNGKey(0)
    kx, kw, kb = jax.random.split(key, 3)

    x = jax.random.normal(kx, (batch, seq_len, word_dim), dtype=jnp.float32)

    # Conv2d(1, out_channels, (window_size, word_dim)) params: torch weight
    # (C, 1, ws, D), bias (C,) -> rearranged to (ws, D, C).
    w_torch = jax.random.normal(
        kw, (out_channels, 1, window_size, word_dim), dtype=jnp.float32) * 0.1
    bias = jax.random.normal(kb, (out_channels,), dtype=jnp.float32) * 0.1
    weight = jnp.transpose(w_torch[:, 0, :, :], (1, 2, 0))  # (ws, D, C)

    out = jax.block_until_ready(cnn_maxpool(x, weight, bias))
    assert out.shape == (batch, out_channels)

    # Apples-to-apples reference: identical bf16-rounded operands, f32 math.
    x_bf = x.astype(jnp.bfloat16).astype(jnp.float32)
    w_bf = weight.astype(jnp.bfloat16).astype(jnp.float32)
    ref_bf = cnn_maxpool_ref(x_bf, w_bf, bias)
    assert jnp.allclose(out, ref_bf, atol=2e-3, rtol=2e-3), (out, ref_bf)

    # Sanity vs the full-f32 reference (loose tolerance: bf16 MXU operands).
    ref = cnn_maxpool_ref(x, weight, bias)
    assert jnp.allclose(out, ref, atol=5e-2, rtol=5e-2), (out, ref)

    print("KERNEL_OK")
</pallas_src>

<mosaic_0001>
module attributes {stable_mosaic.version = 11 : i64} {
  func.func @_cnn_maxpool_kernel(%arg0: i32, %arg1: memref<8x16x32xbf16, #tpu.memory_space<vmem>>, %arg2: memref<128x128xbf16, #tpu.memory_space<vmem>>, %arg3: memref<1x128xf32, #tpu.memory_space<vmem>>, %arg4: memref<8x128xf32, #tpu.memory_space<vmem>>) attributes {dimension_semantics = [#tpu.dimension_semantics<parallel>], iteration_bounds = array<i64: 1>, scalar_prefetch = 0 : i64, scratch_operands = 0 : i64, tpu.core_type = #tpu.core_type<tc>, window_params = [{transform_indices = @transform_0, window_bounds = array<i64: 8, 16, 32>}, {pipeline_mode = #tpu.pipeline_mode<synchronous>, transform_indices = @transform_1, window_bounds = array<i64: 128, 128>}, {pipeline_mode = #tpu.pipeline_mode<synchronous>, transform_indices = @transform_2, window_bounds = array<i64: 1, 128>}, {transform_indices = @transform_3, window_bounds = array<i64: 8, 128>}]} {
    %c0 = arith.constant 0 : index
    %c0_0 = arith.constant 0 : index
    %c0_1 = arith.constant 0 : index
    %0 = vector.load %arg1[%c0, %c0_0, %c0_1] : memref<8x16x32xbf16, #tpu.memory_space<vmem>>, vector<8x16x32xbf16>
    %1 = arith.extf %0 : vector<8x16x32xbf16> to vector<8x16x32xf32>
    %2 = vector.shape_cast %1 : vector<8x16x32xf32> to vector<128x32xf32>
    %c127_i32 = arith.constant 127 : i32
    %3 = tpu.dynamic_rotate %2 by %c127_i32 dim 0 : vector<128x32xf32>, i32 -> vector<128x32xf32>
    %c126_i32 = arith.constant 126 : i32
    %4 = tpu.dynamic_rotate %2 by %c126_i32 dim 0 : vector<128x32xf32>, i32 -> vector<128x32xf32>
    %cst = arith.constant 0.000000e+00 : f32
    %5 = vector.broadcast %cst : f32 to vector<128x32xf32>
    %6 = tpu.concatenate %2, %3, %4, %5 in 1 : vector<128x32xf32>, vector<128x32xf32>, vector<128x32xf32>, vector<128x32xf32> -> vector<128x128xf32>
    %7 = arith.truncf %6 : vector<128x128xf32> to vector<128x128xbf16>
    %c0_2 = arith.constant 0 : index
    %c0_3 = arith.constant 0 : index
    %8 = vector.load %arg2[%c0_2, %c0_3] : memref<128x128xbf16, #tpu.memory_space<vmem>>, vector<128x128xbf16>
    %cst_4 = arith.constant dense<0.000000e+00> : vector<128x128xf32>
    %9 = tpu.matmul %7, %8, %cst_4 {dimension_numbers = #tpu.dot_dimension_numbers<[1], [0], [0], [1], [0, 0, 1, 1], [], []>} : vector<128x128xbf16>, vector<128x128xbf16>, vector<128x128xf32> -> vector<128x128xf32>
    %10 = vector.shape_cast %9 : vector<128x128xf32> to vector<8x16x128xf32>
    %11 = tpu.iota {dimensions = array<i32: 0>} : vector<16x1xi32>
    %c14_i32 = arith.constant 14 : i32
    %12 = vector.broadcast %c14_i32 : i32 to vector<16x1xi32>
    %13 = arith.cmpi slt, %11, %12 : vector<16x1xi32>
    %14 = vector.shape_cast %13 : vector<16x1xi1> to vector<1x16x1xi1>
    %cst_5 = arith.constant 0xFF800000 : f32
    %15 = vector.shape_cast %14 : vector<1x16x1xi1> to vector<1x16x1xi1>
    %16 = vector.broadcast %15 : vector<1x16x1xi1> to vector<8x16x128xi1>
    %17 = vector.broadcast %cst_5 : f32 to vector<8x16x128xf32>
    %18 = arith.select %16, %10, %17 : vector<8x16x128xi1>, vector<8x16x128xf32>
    %cst_6 = arith.constant dense<0xFF800000> : vector<8x128xf32>
    %19 = vector.multi_reduction <maximumf>, %18, %cst_6 [1] : vector<8x16x128xf32> to vector<8x128xf32>
    %c0_7 = arith.constant 0 : index
    %c0_8 = arith.constant 0 : index
    %20 = vector.load %arg3[%c0_7, %c0_8] : memref<1x128xf32, #tpu.memory_space<vmem>>, vector<1x128xf32>
    %21 = vector.broadcast %20 : vector<1x128xf32> to vector<8x128xf32>
    %22 = arith.addf %19, %21 : vector<8x128xf32>
    %c0_9 = arith.constant 0 : index
    %c0_10 = arith.constant 0 : index
    %23 = vector.load %arg4[%c0_9, %c0_10] : memref<8x128xf32, #tpu.memory_space<vmem>>, vector<8x128xf32>
    tpu.vector_store %arg4[%c0_9, %c0_10], %22 {strides = array<i32>} : memref<8x128xf32, #tpu.memory_space<vmem>>, vector<8x128xf32>,
    return
  }
  func.func @transform_0(%arg0: i32) -> (i32, i32, i32) {
    %c0_i32 = arith.constant 0 : i32
    %c0_i32_0 = arith.constant 0 : i32
    %c0_i32_1 = arith.constant 0 : i32
    return %arg0, %c0_i32, %c0_i32_0 : i32, i32, i32
  }
  func.func @transform_1(%arg0: i32) -> (i32, i32) {
    %c0_i32 = arith.constant 0 : i32
    %c0_i32_0 = arith.constant 0 : i32
    %c0_i32_1 = arith.constant 0 : i32
    return %c0_i32, %c0_i32_0 : i32, i32
  }
  func.func @transform_2(%arg0: i32) -> (i32, i32) {
    %c0_i32 = arith.constant 0 : i32
    %c0_i32_0 = arith.constant 0 : i32
    %c0_i32_1 = arith.constant 0 : i32
    return %c0_i32, %c0_i32_0 : i32, i32
  }
  func.func @transform_3(%arg0: i32) -> (i32, i32) {
    %c0_i32 = arith.constant 0 : i32
    %c0_i32_0 = arith.constant 0 : i32
    return %arg0, %c0_i32 : i32, i32
  }
}

</mosaic_0001>

<bundles_post_ra>
// kernel: tpu_custom_call.1
= control target key start
LH: loop header
LB: loop body
LE: loop exit
PB: predicated region body
PF: predicated region fallthrough
CT: control target
= control target key end

     0   :  { %8 = vsyncpa [#allocation3], 0  ;;  %s1194_s0 = inlined_call_operand.hbm [shape: bf16[8,16,32], index: 0, kind: input, shape index: {}]   ;;  %s1195_s1 = inlined_call_operand.hbm [shape: bf16[128,128], index: 1, kind: input, shape index: {}]   ;;  %s1196_s2 = inlined_call_operand.vmem [shape: f32[1,128], index: 2, kind: input, shape index: {}]   ;;  %s1197_s3 = inlined_call_operand.hbm [shape: f32[8,128], index: 3, kind: output, shape index: {}]  }
   0x1   :  { %9 = vsyncpa [#allocation6], 0 }
   0x2   :  { %10 = vsyncpa [#allocation4], 0  ;;  %s15_s14 = sshll.u32 %s1194_s0, 4  ;;  %s879_s15 = smov [#allocation2]   ;;  %s16_s14 = int_to_ptr.hbm [resolvable:$true] %s15_s14 }
   0x3   :  { %s17_s16 = sshll.u32 %s879_s15, 4  ;;  %s28_s19 = sshll.u32 %s1195_s1, 4  ;;  %s18_s16 = int_to_ptr.vmem [resolvable:$true] %s17_s16  ;;  %s29_s19 = int_to_ptr.hbm [resolvable:$true] %s28_s19 }
   0x4   :  { %s880_s20 = smov 64   ;;  %s881_s21 = smov 4  }
   0x5   :  { %23 = dma.hbm_to_vmem [thread:$0]  %s16_s14, 1024, %s18_s16, [#allocation3], %s880_s20, %s880_s20, %s881_s21  }
   0x6   :  { %s882_s22 = smov [#allocation5]  }
   0x7   :  { %s30_s23 = sshll.u32 %s882_s22, 4  ;;  %s31_s23 = int_to_ptr.vmem [resolvable:$true] %s30_s23 }
   0x8   :  { %36 = dma.hbm_to_vmem [thread:$0]  %s29_s19, 1024, %s31_s23, [#allocation6], %s880_s20, %s880_s20, %s881_s21  }
   0x9   :  { %873 = dma.done.wait [#allocation3], 1024  }
   0xa   :  { %874 = vsyncadd [#allocation3], 4294966272 }
   0xb   :  { %875 = dma.done.wait [#allocation6], 1024  }
   0xc   :  { %876 = vsyncadd [#allocation6], 4294966272  ;;  %v95_v0 = vlaneseq  ;;  %v686_v2 = vld [vmem:[#allocation2 + $0x20] sm:$0xff]   ;;  %v687_v3 = vld [vmem:[#allocation2 + $0x28] sm:$0xff]   ;;  %s883_s0 = smov 32   ;;  %vm275_vm2 = vcmask 261120  }
   0xd   :  { %v652_v4 = vld [vmem:[#allocation2] sm:$0xff]   ;;  %v917_v5 = vunpack.c.l.bf16 %v686_v2  ;;  %v919_v6 = vunpack.c.h.bf16 %v686_v2  ;;  %v921_v7 = vunpack.c.l.bf16 %v687_v3  ;;  %v683_v9 = vld [vmem:[#allocation2 + $0x8] sm:$0xff]   ;;  %v688_v10 = vld [vmem:[#allocation2 + $0x30] sm:$0xff]   ;;  %v1004_v55 = vunpack.c.h.bf16 %v687_v3  ;;  %s576_s28 = sshll.u32 %s1197_s3, 4  ;;  %s577_s28 = int_to_ptr.hbm [resolvable:$true] %s576_s28 }
   0xe   :  { %v915_v1 = vshrl.u32 %v95_v0, 7  ;;  %v923_v8 = vunpack.c.l.bf16 %v652_v4  ;;  %v926_v11 = vunpack.c.h.bf16 %v652_v4  ;;  %v928_v12 = vunpack.c.l.bf16 %v683_v9  ;;  %v940_v22 = vld [vmem:[#allocation2 + $0x38] sm:$0xff]   ;;  %v684_v27 = vld [vmem:[#allocation2 + $0x10] sm:$0xff]  }
   0xf   :  { %v930_v13 = vunpack.c.l.bf16 %v688_v10  ;;  %v87_v14 = vrot.slane %v917_v5, 1  ;;  %v88_v15 = vrot.slane %v919_v6, 1  ;;  %v89_v16 = vrot.slane %v921_v7, 1  ;;  %v962_v31 = vld [vmem:[#allocation2 + $0x18] sm:$0xff]  }
  0x10   :  { %vm97_vm0 = vcmp.lt.s32.totalorder %v915_v1, 7  ;;  %v79_v17 = vrot.slane %v923_v8, 1  ;;  %v80_v18 = vrot.slane %v926_v11, 1  ;;  %v81_v19 = vrot.slane %v928_v12, 1 }
  0x11   :  { %v122_v20 = vrot.slane %v917_v5, 2  ;;  %v123_v21 = vrot.slane %v919_v6, 2  ;;  %v103_v23 = vsel %vm97_vm0, %v88_v15, %v89_v16  ;;  %v104_v24 = vsel %vm97_vm0, %v87_v14, %v88_v15  ;;  %v650_v15 = vld [vmem:[#allocation5 + $0x38] sm:$0xff] }
  0x12   :  { %v124_v25 = vrot.slane %v921_v7, 2  ;;  %v951_v26 = vunpack.c.h.bf16 %v688_v10  ;;  %v720_v28 = vpack.i.bf16 %v103_v23, %v104_v24  ;;  %v111_v29 = vsel %vm97_vm0, %v80_v18, %v81_v19  ;;  %398 = vmatpush.bf16.msra.mxu0 %v650_v15  ;;  %v649_v24 = vld [vmem:[#allocation5 + $0x30] sm:$0xff]  ;;  %691 = vmatpush.bf16.msra.mxu2 %v650_v15 }
  0x13   :  { %v112_v30 = vsel %vm97_vm0, %v79_v17, %v80_v18  ;;  %vm130_vm1 = vcmp.lt.s32.totalorder %v915_v1, 6  ;;  %v965_v33 = vunpack.c.l.bf16 %v940_v22  ;;  %v91_v34 = vrot.slane %v930_v13, 1  ;;  %692 = vmatpush.bf16.msra.mxu3 %v650_v15  ;;  %690 = vmatpush.bf16.msra.mxu1 %v650_v15 }
  0x14   :  { %v730_v32 = vpack.i.bf16 %v111_v29, %v112_v30  ;;  %721 = vrot.lane.b32.xlu0 %v720_v28, %s883_s0  ;;  %v92_v35 = vrot.slane %v951_v26, 1  ;;  %v970_v36 = vunpack.c.l.bf16 %v684_v27  ;;  %v972_v37 = vunpack.c.h.bf16 %v684_v27 }
  0x15   :  { %v136_v38 = vsel %vm130_vm1, %v123_v21, %v124_v25  ;;  %v137_v39 = vsel %vm130_vm1, %v122_v20, %v123_v21  ;;  %v93_v40 = vrot.slane %v965_v33, 1  ;;  %v983_v41 = vunpack.c.l.bf16 %v962_v31 }
  0x16   :  { %731 = vrot.lane.b32.xlu1 %v730_v32, %s883_s0  ;;  %v100_v42 = vsel %vm97_vm0, %v91_v34, %v92_v35  ;;  %v725_v44 = vpack.i.bf16 %v136_v38, %v137_v39  ;;  %v83_v45 = vrot.slane %v970_v36, 1  ;;  %v84_v46 = vrot.slane %v972_v37, 1  ;;  %399 = vmatpush.bf16.msra.mxu0 %v649_v24  ;;  %v648_v39 = vld [vmem:[#allocation5 + $0x28] sm:$0xff] }
  0x17   :  { %v99_v43 = vsel %vm97_vm0, %v92_v35, %v93_v40  ;;  %v85_v47 = vrot.slane %v983_v41, 1  ;;  %v119_v49 = vrot.slane %v972_v37, 2  ;;  %v120_v50 = vrot.slane %v983_v41, 2  ;;  %694 = vmatpush.bf16.msra.mxu2 %v649_v24  ;;  %695 = vmatpush.bf16.msra.mxu3 %v649_v24 }
  0x18   :  { %v735_v48 = vpack.i.bf16 %v99_v43, %v100_v42  ;;  %v114_v51 = vrot.slane %v923_v8, 2  ;;  %v118_v52 = vrot.slane %v970_v36, 2  ;;  %v115_v53 = vrot.slane %v926_v11, 2  ;;  %693 = vmatpush.bf16.msra.mxu1 %v649_v24 }
  0x19   :  { %v1001_v54 = vunpack.c.h.bf16 %v683_v9  ;;  %v116_v56 = vrot.slane %v928_v12, 2  ;;  %v107_v57 = vsel %vm97_vm0, %v84_v46, %v85_v47  ;;  %v108_v58 = vsel %vm97_vm0, %v83_v45, %v84_v46 }
  0x1a   :  { %v140_v59 = vsel %vm130_vm1, %v119_v49, %v120_v50  ;;  %v145_v60 = vsel %vm130_vm1, %v114_v51, %v115_v53  ;;  %v141_v61 = vsel %vm130_vm1, %v118_v52, %v119_v49  ;;  %v128_v63 = vrot.slane %v965_v33, 2  ;;  %400 = vmatpush.bf16.msra.mxu0 %v648_v39 }
  0x1b   :  { %v144_v62 = vsel %vm130_vm1, %v115_v53, %v116_v56  ;;  %v127_v0 = vrot.slane %v951_v26, 2  ;;  %v750_v3 = vpack.i.bf16 %v107_v57, %v108_v58  ;;  %v126_v4 = vrot.slane %v930_v13, 2  ;;  %697 = vmatpush.bf16.msra.mxu2 %v648_v39  ;;  %698 = vmatpush.bf16.msra.mxu3 %v648_v39 }
  0x1c   :  { %726 = vrot.lane.b32.xlu0 %v725_v44, %s880_s20  ;;  %v740_v2 = vpack.i.bf16 %v144_v62, %v145_v60  ;;  %v755_v9 = vpack.i.bf16 %v140_v59, %v141_v61  ;;  %v125_v10 = vrot.slane %v1004_v55, 2  ;;  %v82_v18 = vrot.slane %v1001_v54, 1  ;;  %696 = vmatpush.bf16.msra.mxu1 %v648_v39  ;;  %v645_v60 = vld [vmem:[#allocation5 + $0x10] sm:$0xff] }
  0x1d   :  { %v132_v21 = vsel %vm130_vm1, %v127_v0, %v128_v63  ;;  %v133_v23 = vsel %vm130_vm1, %v126_v4, %v127_v0  ;;  %v1049_v35 = vunpack.c.h.bf16 %v940_v22  ;;  %v90_v38 = vrot.slane %v1004_v55, 1 }
  0x1e   :  { %736 = vrot.lane.b32.xlu1 %v735_v48, %s883_s0  ;;  %741 = vrot.lane.b32.xlu2 %v740_v2, %s880_s20  ;;  %v134_v27 = vsel %vm130_vm1, %v125_v10, %v126_v4  ;;  %v135_v28 = vsel %vm130_vm1, %v124_v25, %v125_v10  ;;  %v745_v29 = vpack.i.bf16 %v132_v21, %v133_v23  ;;  %v117_v43 = vrot.slane %v1001_v54, 2 }
  0x1f   :  { %v109_v30 = vsel %vm97_vm0, %v82_v18, %v83_v45  ;;  %v110_v32 = vsel %vm97_vm0, %v81_v19, %v82_v18  ;;  %v765_v25 = vpack.i.bf16 %v134_v27, %v135_v28  ;;  %v129_v44 = vrot.slane %v1049_v35, 2  ;;  %v647_v45 = vld [vmem:[#allocation5 + $0x20] sm:$0xff] }
  0x20   :  { %v770_v42 = vpack.i.bf16 %v109_v30, %v110_v32  ;;  %v101_v19 = vsel %vm97_vm0, %v90_v38, %v91_v34  ;;  %v102_v22 = vsel %vm97_vm0, %v89_v16, %v90_v38  ;;  %v142_v46 = vsel %vm130_vm1, %v117_v43, %v118_v52  ;;  %401 = vmatpush.bf16.msra.mxu0 %v647_v45  ;;  %v646_v52 = vld [vmem:[#allocation5 + $0x18] sm:$0xff] }
  0x21   :  { %v143_v48 = vsel %vm130_vm1, %v116_v56, %v117_v43  ;;  %v1070_v34 = vunpack.c.h.bf16 %v962_v31  ;;  %v760_v49 = vpack.i.bf16 %v101_v19, %v102_v22  ;;  %v131_v16 = vsel %vm130_vm1, %v128_v63, %v129_v44  ;;  %700 = vmatpush.bf16.msra.mxu2 %v647_v45  ;;  %701 = vmatpush.bf16.msra.mxu3 %v647_v45  ;;  %v644_v63 = vld [vmem:[#allocation5 + $0x8] sm:$0xff] }
  0x22   :  { %v146_v53 = vsel %vm130_vm1, %v129_v44, %v114_v51  ;;  %v94_v57 = vrot.slane %v1049_v35, 1  ;;  %v780_v56 = vpack.i.bf16 %v142_v46, %v143_v48  ;;  %699 = vmatpush.bf16.msra.mxu1 %v647_v45  ;;  %vm292_vm3 = vcmask 523264  }
  0x23   :  { %v785_v58 = vpack.i.bf16 %v146_v53, %v131_v16  ;;  %v121_v31 = vrot.slane %v1070_v34, 2  ;;  %vm309_vm4 = vcmask 785408   ;;  %vm547_vm7 = vcmask 1041409  }
  0x24   :  { %751 = vrot.lane.b32.xlu0 %v750_v3, %s883_s0  ;;  %v98_v59 = vsel %vm97_vm0, %v93_v40, %v94_v57  ;;  %v113_v51 = vsel %vm97_vm0, %v94_v57, %v79_v17  ;;  %402 = vmatpush.bf16.msra.mxu0 %v646_v52  ;;  %v86_v17 = vrot.slane %v1070_v34, 1  ;;  %v643_v3 = vld [vmem:[#allocation5] sm:$0xff]  ;;  %vm1117_vm5 = vmpackc.low %vm309_vm4, %vm309_vm4  ;;  %vm550_vm8 = vcmask 1042434  }
  0x25   :  { %v138_v61 = vsel %vm130_vm1, %v121_v31, %v122_v20  ;;  %v139_v40 = vsel %vm130_vm1, %v120_v50, %v121_v31  ;;  %v775_v62 = vpack.i.bf16 %v113_v51, %v98_v59  ;;  %703 = vmatpush.bf16.msra.mxu2 %v646_v52  ;;  %704 = vmatpush.bf16.msra.mxu3 %v646_v52  ;;  %vm553_vm9 = vcmask 1043459  }
  0x26   :  { %756 = vrot.lane.b32.xlu1 %v755_v9, %s880_s20  ;;  %746 = vrot.lane.b32.xlu2 %v745_v29, %s880_s20  ;;  %v795_v0 = vpack.i.bf16 %v138_v61, %v139_v40  ;;  %v105_v20 = vsel %vm97_vm0, %v86_v17, %v87_v14  ;;  %v106_v50 = vsel %vm97_vm0, %v85_v47, %v86_v17  ;;  %vm556_vm10 = vcmask 1044484  }
  0x27   :  { %702 = vmatpush.bf16.msra.mxu1 %v646_v52  ;;  %v790_v2 = vpack.i.bf16 %v105_v20, %v106_v50  ;;  %vm559_vm11 = vcmask 1045509   ;;  %vm562_vm12 = vcmask 1046534   ;;  %vm565_vm13 = vcmask 1047559  }
  0x28   :  { %403 = vmatpush.bf16.msra.mxu0 %v645_v60 }
  0x29   :  { %706 = vmatpush.bf16.msra.mxu2 %v645_v60  ;;  %707 = vmatpush.bf16.msra.mxu3 %v645_v60 }
  0x2b   :  { %705 = vmatpush.bf16.msra.mxu1 %v645_v60 }
  0x2c   :  { %766 = vrot.lane.b32.xlu0 %v765_v25, %s880_s20  ;;  %404 = vmatpush.bf16.msra.mxu0 %v644_v63 }
  0x2d   :  { %709 = vmatpush.bf16.msra.mxu2 %v644_v63  ;;  %710 = vmatpush.bf16.msra.mxu3 %v644_v63 }
  0x2e   :  { %771 = vrot.lane.b32.xlu1 %v770_v42, %s883_s0  ;;  %761 = vrot.lane.b32.xlu2 %v760_v49, %s883_s0 }
  0x2f   :  { %708 = vmatpush.bf16.msra.mxu1 %v644_v63 }
  0x30   :  { %405 = vmatpush.bf16.msra.mxu0 %v643_v3 }
  0x31   :  { %712 = vmatpush.bf16.msra.mxu2 %v643_v3  ;;  %713 = vmatpush.bf16.msra.mxu3 %v643_v3 }
  0x33   :  { %711 = vmatpush.bf16.msra.mxu1 %v643_v3 }
  0x34   :  { %781 = vrot.lane.b32.xlu0 %v780_v56, %s880_s20 }
  0x36   :  { %786 = vrot.lane.b32.xlu1 %v785_v58, %s880_s20  ;;  %776 = vrot.lane.b32.xlu2 %v775_v62, %s883_s0 }
  0x3c   :  { %796 = vrot.lane.b32.xlu0 %v795_v0, %s880_s20 }
  0x3e   :  { %791 = vrot.lane.b32.xlu2 %v790_v2, %s883_s0 }
  0x78   :  { %v742_v14 = vpop.permute.xlu2 %741 }
  0x79   :  { %v744_v9 = vunpack.i.h.bf16 %v742_v14  ;;  %v743_v10 = vunpack.i.l.bf16 %v742_v14 }
  0x80   :  { %v747_v24 = vpop.permute.xlu2 %746 }
  0x81   :  { %v748_v43 = vunpack.i.l.bf16 %v747_v24 }
  0x86   :  { %v722_v4 = vpop.permute.xlu0 %721 }
  0x87   :  { %v724_v30 = vunpack.i.h.bf16 %v722_v4  ;;  %v723_v32 = vunpack.i.l.bf16 %v722_v4 }
  0x88   :  { %v732_v47 = vpop.permute.xlu1 %731  ;;  %v762_v57 = vpop.permute.xlu2 %761 }
  0x89   :  { %v734_v15 = vunpack.i.h.bf16 %v732_v47  ;;  %v733_v18 = vunpack.i.l.bf16 %v732_v47  ;;  %v285_v44 = vsel %vm275_vm2, %v919_v6, %v724_v30  ;;  %v284_v19 = vsel %vm275_vm2, %v917_v5, %v723_v32 }
  0x8a   :  { %v764_v61 = vunpack.i.h.bf16 %v762_v57  ;;  %v763_v40 = vunpack.i.l.bf16 %v762_v57 }
  0x8b   :  { %v277_v21 = vsel %vm275_vm2, %v926_v11, %v734_v15  ;;  %v276_v23 = vsel %vm275_vm2, %v923_v8, %v733_v18  ;;  %v749_v8 = vunpack.i.h.bf16 %v747_v24 }
  0x8c   :  { %v293_v27 = vsel %vm292_vm3, %v276_v23, %v743_v10  ;;  %v294_v28 = vsel %vm292_vm3, %v277_v21, %v744_v9  ;;  %v287_v20 = vsel %vm275_vm2, %v1004_v55, %v764_v61 }
  0x8d   :  { %v620_v38 = vpack.c.bf16 %v294_v28, %v293_v27 }
  0x8e   :  { %v727_v39 = vpop.permute.xlu0 %726 }
  0x8f   :  { %621 = vmatmul.msk.bf16.vlgmr.msra.gmra.mxu0 %vm1117_vm5, %v620_v38  ;;  %v729_v11 = vunpack.i.h.bf16 %v727_v39  ;;  %v728_v25 = vunpack.i.l.bf16 %v727_v39 }
  0x90   :  { %v737_v42 = vpop.permute.xlu1 %736  ;;  %v777_v0 = vpop.permute.xlu2 %776 }
  0x91   :  { %v739_v22 = vunpack.i.h.bf16 %v737_v42  ;;  %v738_v45 = vunpack.i.l.bf16 %v737_v42  ;;  %v301_v46 = vsel %vm292_vm3, %v284_v19, %v728_v25  ;;  %v302_v48 = vsel %vm292_vm3, %v285_v44, %v729_v11 }
  0x92   :  { %v632_v53 = vpack.c.bf16 %v302_v48, %v301_v46  ;;  %v779_v15 = vunpack.i.h.bf16 %v777_v0  ;;  %v778_v18 = vunpack.i.l.bf16 %v777_v0 }
  0x93   :  { %v289_v49 = vsel %vm275_vm2, %v951_v26, %v739_v22  ;;  %v288_v16 = vsel %vm275_vm2, %v930_v13, %v738_v45 }
  0x94   :  { %v305_v52 = vsel %vm292_vm3, %v288_v16, %v748_v43  ;;  %v306_v6 = vsel %vm292_vm3, %v289_v49, %v749_v8  ;;  %633 = vmatmul.msk.bf16.vlgmr.msra.gmra.mxu2 %vm1117_vm5, %v632_v53  ;;  %v291_v24 = vsel %vm275_vm2, %v1049_v35, %v779_v15  ;;  %v290_v27 = vsel %vm275_vm2, %v965_v33, %v778_v18 }
  0x95   :  { %v638_v5 = vpack.c.bf16 %v306_v6, %v305_v52 }
  0x96   :  { %v752_v56 = vpop.permute.xlu0 %751 }
  0x97   :  { %639 = vmatmul.msk.bf16.vlgmr.msra.gmra.mxu3 %vm1117_vm5, %v638_v5  ;;  %v754_v58 = vunpack.i.h.bf16 %v752_v56  ;;  %v753_v31 = vunpack.i.l.bf16 %v752_v56  ;;  %v447_v5 = vadd.s32 8, %v915_v1 }
  0x98   :  { %v757_v26 = vpop.permute.xlu1 %756  ;;  %v792_v23 = vpop.permute.xlu2 %791 }
  0x99   :  { %v759_v59 = vunpack.i.h.bf16 %v757_v26  ;;  %v758_v51 = vunpack.i.l.bf16 %v757_v26  ;;  %v281_v13 = vsel %vm275_vm2, %v972_v37, %v754_v58  ;;  %v280_v60 = vsel %vm275_vm2, %v970_v36, %v753_v31 }
  0x9a   :  { %v286_v37 = vsel %vm275_vm2, %v921_v7, %v763_v40  ;;  %v794_v25 = vunpack.i.h.bf16 %v792_v23  ;;  %v793_v43 = vunpack.i.l.bf16 %v792_v23  ;;  %vm449_vm6 = vcmp.lt.s32.totalorder %v447_v5, 14 }
  0x9b   :  { %v297_v62 = vsel %vm292_vm3, %v280_v60, %v758_v51  ;;  %v298_v17 = vsel %vm292_vm3, %v281_v13, %v759_v59 }
  0x9c   :  { %v626_v63 = vpack.c.bf16 %v298_v17, %v297_v62  ;;  %v283_v33 = vsel %vm275_vm2, %v1070_v34, %v794_v25  ;;  %v282_v44 = vsel %vm275_vm2, %v983_v41, %v793_v43 }
  0x9e   :  { %627 = vmatmul.msk.bf16.vlgmr.msra.gmra.mxu1 %vm1117_vm5, %v626_v63  ;;  %v767_v50 = vpop.permute.xlu0 %766 }
  0x9f   :  { %v769_v2 = vunpack.i.h.bf16 %v767_v50  ;;  %v768_v36 = vunpack.i.l.bf16 %v767_v50 }
  0xa0   :  { %v772_v3 = vpop.permute.xlu1 %771 }
  0xa1   :  { %v303_v14 = vsel %vm292_vm3, %v286_v37, %v768_v36  ;;  %v304_v4 = vsel %vm292_vm3, %v287_v20, %v769_v2  ;;  %v774_v47 = vunpack.i.h.bf16 %v772_v3  ;;  %v773_v9 = vunpack.i.l.bf16 %v772_v3 }
  0xa2   :  { %v635_v10 = vpack.c.bf16 %v304_v4, %v303_v14 }
  0xa3   :  { %v279_v55 = vsel %vm275_vm2, %v1001_v54, %v774_v47  ;;  %v278_v7 = vsel %vm275_vm2, %v928_v12, %v773_v9 }
  0xa4   :  { %636 = vmatmul.msk.bf16.gmra.mxu2 %vm1117_vm5, %v635_v10 }
  0xa6   :  { %v782_v21 = vpop.permute.xlu0 %781 }
  0xa7   :  { %v784_v28 = vunpack.i.h.bf16 %v782_v21  ;;  %v783_v30 = vunpack.i.l.bf16 %v782_v21 }
  0xa8   :  { %v787_v32 = vpop.permute.xlu1 %786 }
  0xa9   :  { %v789_v38 = vunpack.i.h.bf16 %v787_v32  ;;  %v788_v39 = vunpack.i.l.bf16 %v787_v32  ;;  %v295_v11 = vsel %vm292_vm3, %v278_v7, %v783_v30  ;;  %v296_v54 = vsel %vm292_vm3, %v279_v55, %v784_v28 }
  0xaa   :  { %v623_v42 = vpack.c.bf16 %v296_v54, %v295_v11 }
  0xab   :  { %v307_v12 = vsel %vm292_vm3, %v290_v27, %v788_v39  ;;  %v308_v8 = vsel %vm292_vm3, %v291_v24, %v789_v38 }
  0xac   :  { %v641_v35 = vpack.c.bf16 %v308_v8, %v307_v12  ;;  %624 = vmatmul.msk.bf16.gmra.mxu0 %vm1117_vm5, %v623_v42 }
  0xae   :  { %642 = vmatmul.msk.bf16.gmra.mxu3 %vm1117_vm5, %v641_v35  ;;  %v797_v19 = vpop.permute.xlu0 %796 }
  0xaf   :  { %v799_v22 = vunpack.i.h.bf16 %v797_v19  ;;  %v798_v45 = vunpack.i.l.bf16 %v797_v19 }
  0xb1   :  { %v299_v46 = vsel %vm292_vm3, %v282_v44, %v798_v45  ;;  %v300_v48 = vsel %vm292_vm3, %v283_v33, %v799_v22 }
  0xb2   :  { %v629_v49 = vpack.c.bf16 %v300_v48, %v299_v46 }
  0xb4   :  { %630 = vmatmul.msk.bf16.gmra.mxu1 %vm1117_vm5, %v629_v49  ;;  %v800_v49 = vld [vmem:[%s1196_s2] ss:$0 sm:$0xff]  ;;  %s884_s2 = smov [#allocation7]  }
  0xb5   :  { %s574_s25 = sshll.u32 %s884_s2, 4  ;;  %s575_s25 = int_to_ptr.vmem [resolvable:$true] %s574_s25 }
 0x10c   :  { %v407_v16 = vpop.f32.mrf.mxu0 }
 0x114   :  { %v409_v34 = vpop.f32.mrf.mxu0 }
 0x115   :  { %v455_v31 = vsel %vm449_vm6, %v409_v34, -inf }
 0x116   :  { %v470_v13 = vmax.f32 %v407_v16, %v455_v31 }
 0x117   :  { %v427_v53 = vpop.f32.mrf.mxu2 }
 0x118   :  { %v471_v17 = vrot.slane %v470_v13, 4 }
 0x11a   :  { %v437_v52 = vpop.f32.mrf.mxu3  ;;  %v472_v4 = vmax.f32 %v470_v13, %v471_v17 }
 0x11b   :  { %v417_v57 = vpop.f32.mrf.mxu1 }
 0x11c   :  { %v473_v21 = vrot.slane %v472_v4, 2 }
 0x11e   :  { %v474_v42 = vmax.f32 %v472_v4, %v473_v21 }
 0x11f   :  { %v429_v6 = vpop.f32.mrf.mxu2 }
 0x120   :  { %v463_v59 = vsel %vm449_vm6, %v429_v6, -inf  ;;  %v475_v48 = vrot.slane %v474_v42, 1 }
 0x121   :  { %v498_v61 = vmax.f32 %v427_v53, %v463_v59 }
 0x122   :  { %v439_v26 = vpop.f32.mrf.mxu3  ;;  %v476_v31 = vmax.f32 %v474_v42, %v475_v48 }
 0x123   :  { %v419_v41 = vpop.f32.mrf.mxu1  ;;  %v467_v60 = vsel %vm449_vm6, %v439_v26, -inf  ;;  %v499_v63 = vrot.slane %v498_v61, 4 }
 0x124   :  { %v459_v56 = vsel %vm449_vm6, %v419_v41, -inf  ;;  %v512_v40 = vmax.f32 %v437_v52, %v467_v60 }
 0x125   :  { %v484_v51 = vmax.f32 %v417_v57, %v459_v56  ;;  %v500_v10 = vmax.f32 %v498_v61, %v499_v63 }
 0x126   :  { %v513_v36 = vrot.slane %v512_v40, 4 }
 0x127   :  { %v432_v58 = vpop.f32.mrf.mxu2  ;;  %v485_v62 = vrot.slane %v484_v51, 4  ;;  %v501_v24 = vrot.slane %v500_v10, 2 }
 0x128   :  { %v514_v55 = vmax.f32 %v512_v40, %v513_v36 }
 0x129   :  { %v412_v29 = vpop.f32.mrf.mxu0  ;;  %v486_v3 = vmax.f32 %v484_v51, %v485_v62  ;;  %v502_v43 = vmax.f32 %v500_v10, %v501_v24  ;;  %v530_v62 = vadd.f32 %v800_v49, %v476_v31 }
 0x12a   :  { %v515_v39 = vrot.slane %v514_v55, 2 }
 0x12b   :  { %v487_v7 = vrot.slane %v486_v3, 2  ;;  %v503_v57 = vrot.slane %v502_v43, 1 }
 0x12c   :  { %v516_v22 = vmax.f32 %v514_v55, %v515_v39 }
 0x12d   :  { %v488_v11 = vmax.f32 %v486_v3, %v487_v7  ;;  %v504_v59 = vmax.f32 %v502_v43, %v503_v57 }
 0x12e   :  { %v517_v41 = vrot.slane %v516_v22, 1 }
 0x12f   :  { %v434_v1 = vpop.f32.mrf.mxu2  ;;  %v489_v45 = vrot.slane %v488_v11, 1  ;;  %v534_v63 = vadd.f32 %v800_v49, %v504_v59 }
 0x130   :  { %v465_v0 = vsel %vm449_vm6, %v434_v1, -inf  ;;  %v518_v61 = vmax.f32 %v516_v22, %v517_v41 }
 0x131   :  { %v442_v20 = vpop.f32.mrf.mxu3  ;;  %v505_v37 = vmax.f32 %v432_v58, %v465_v0  ;;  %v414_v50 = vpop.f32.mrf.mxu0  ;;  %v490_v56 = vmax.f32 %v488_v11, %v489_v45 }
 0x132   :  { %v422_v2 = vpop.f32.mrf.mxu1  ;;  %v457_v14 = vsel %vm449_vm6, %v414_v50, -inf  ;;  %v536_v50 = vadd.f32 %v800_v49, %v518_v61 }
 0x133   :  { %v506_v47 = vrot.slane %v505_v37, 4  ;;  %v477_v9 = vmax.f32 %v412_v29, %v457_v14  ;;  %v532_v40 = vadd.f32 %v800_v49, %v490_v56  ;;  %v555_v14 = vrot.slane %v534_v63, 4 }
 0x134   :  { %v561_v10 = vrot.slane %v536_v50, 2 }
 0x135   :  { %v507_v15 = vmax.f32 %v505_v37, %v506_v47  ;;  %v478_v18 = vrot.slane %v477_v9, 4 }
 0x137   :  { %v479_v23 = vmax.f32 %v477_v9, %v478_v18  ;;  %v508_v28 = vrot.slane %v507_v15, 2 }
 0x139   :  { %v444_v27 = vpop.f32.mrf.mxu3  ;;  %v480_v30 = vrot.slane %v479_v23, 2  ;;  %v509_v33 = vmax.f32 %v507_v15, %v508_v28 }
 0x13a   :  { %v469_v32 = vsel %vm449_vm6, %v444_v27, -inf  ;;  %v424_v38 = vpop.f32.mrf.mxu1 }
 0x13b   :  { %v519_v54 = vmax.f32 %v442_v20, %v469_v32  ;;  %v461_v25 = vsel %vm449_vm6, %v424_v38, -inf  ;;  %v481_v12 = vmax.f32 %v479_v23, %v480_v30  ;;  %v510_v6 = vrot.slane %v509_v33, 1 }
 0x13c   :  { %v491_v8 = vmax.f32 %v422_v2, %v461_v25  ;;  %v549_v2 = vrot.slane %v532_v40, 6 }
 0x13d   :  { %v520_v35 = vrot.slane %v519_v54, 4  ;;  %v482_v44 = vrot.slane %v481_v12, 1  ;;  %v511_v51 = vmax.f32 %v509_v33, %v510_v6 }
 0x13e   :  { %v492_v19 = vrot.slane %v491_v8, 4 }
 0x13f   :  { %v521_v46 = vmax.f32 %v519_v54, %v520_v35  ;;  %v483_v16 = vmax.f32 %v481_v12, %v482_v44  ;;  %v535_v0 = vadd.f32 %v800_v49, %v511_v51 }
 0x140   :  { %v493_v53 = vmax.f32 %v491_v8, %v492_v19 }
 0x141   :  { %v522_v52 = vrot.slane %v521_v46, 2  ;;  %v531_v34 = vadd.f32 %v800_v49, %v483_v16  ;;  %v558_v47 = vrot.slane %v535_v0, 3 }
 0x142   :  { %v494_v5 = vrot.slane %v493_v53, 2 }
 0x143   :  { %v523_v58 = vmax.f32 %v521_v46, %v522_v52  ;;  %v546_v13 = vrot.slane %v531_v34, 7 }
 0x144   :  { %v495_v26 = vmax.f32 %v493_v53, %v494_v5 }
 0x145   :  { %v524_v29 = vrot.slane %v523_v58, 1  ;;  %v548_v20 = vsel %vm547_vm7, %v546_v13, %v530_v62 }
 0x146   :  { %v496_v60 = vrot.slane %v495_v26, 1  ;;  %v551_v4 = vsel %vm550_vm8, %v549_v2, %v548_v20 }
 0x147   :  { %v525_v17 = vmax.f32 %v523_v58, %v524_v29 }
 0x148   :  { %v497_v1 = vmax.f32 %v495_v26, %v496_v60 }
 0x149   :  { %v537_v3 = vadd.f32 %v800_v49, %v525_v17 }
 0x14a   :  { %v533_v37 = vadd.f32 %v800_v49, %v497_v1 }
 0x14b   :  { %v564_v55 = vrot.slane %v537_v3, 1 }
 0x14c   :  { %v552_v36 = vrot.slane %v533_v37, 5 }
 0x14e   :  { %v554_v9 = vsel %vm553_vm9, %v552_v36, %v551_v4 }
 0x14f   :  { %v557_v15 = vsel %vm556_vm10, %v555_v14, %v554_v9 }
 0x150   :  { %v560_v18 = vsel %vm559_vm11, %v558_v47, %v557_v15 }
 0x151   :  { %v563_v7 = vsel %vm562_vm12, %v561_v10, %v560_v18 }
 0x152   :  { %v566_v21 = vsel %vm565_vm13, %v564_v55, %v563_v7 }
 0x153   :  { %568 = vst [vmem:[#allocation7] sm:$0xff] %v566_v21 }
 0x154   :  { %579 = dma.vmem_to_hbm [thread:$0]  %s575_s25, 128, %s577_s28, [#allocation4]  }
 0x155   :  { %877 = dma.done.wait [#allocation4], 128  }
 0x156   :  { %878 = vsyncadd [#allocation4], 4294967168 }
 0x157   :  { %584 = vsyncpa [#allocation3], 1 }
 0x158   :  { %585 = vsyncpa [#allocation6], 1 }
 0x159   :  { %586 = vsyncpa [#allocation4], 1 }

</bundles_post_ra>
